<compile_context>
chip_gen: v7x
topology: tpu7x:2x2x1
jax: 0.10.0
libtpu: 0.0.40
codegen_flags: <defaults>
</compile_context>

<pallas_src>
import jax
import jax.numpy as jnp
from jax.experimental import pallas as pl
from jax.experimental.pallas import tpu as pltpu


_MIN_PALLAS_ROWS = 512          # below this, XLA's fusion wins (grid=(1,))
_RESIDENT_SINGLE_BUF_BYTES = 4 << 20   # auto-enable Buffered(1) above this


def _round_up(x: int, m: int) -> int:
    return (x + m - 1) // m * m


# --------------------------------------------------------------------------
# One-time parameter preparation (cache the result; do NOT call per forward).
# --------------------------------------------------------------------------
def prepare_params(w1, b1, w2, b2):
    """Pad hidden dim to 128 lanes and cast weights to bf16, once.

    w1: (D_in, H), b1: (H,), w2: (H, D_out), b2: (D_out,).
    Zero padding of H is exact: padded fc1 columns produce ReLU(0)=0 which then
    multiplies zero rows of the padded fc2 weight.
    """
    D_in, H = w1.shape
    H2, D_out = w2.shape
    assert H2 == H
    H_p = _round_up(H, 128)

    w1p = jnp.zeros((D_in, H_p), jnp.bfloat16).at[:, :H].set(w1.astype(jnp.bfloat16))
    b1p = jnp.zeros((1, H_p), jnp.float32).at[0, :H].set(b1.astype(jnp.float32))
    w2p = jnp.zeros((H_p, D_out), jnp.bfloat16).at[:H, :].set(w2.astype(jnp.bfloat16))
    b2p = b2.astype(jnp.float32).reshape(1, D_out)
    return w1p, b1p, w2p, b2p


# --------------------------------------------------------------------------
# Kernel
# --------------------------------------------------------------------------
def _mlp_kernel(x_ref, w1_ref, b1_ref, w2_ref, b2_ref, out_ref):
    # x streamed in its original dtype; cast to bf16 in VMEM for the MXU.
    x = x_ref[...].astype(jnp.bfloat16)
    # fc1: bf16 operands, f32 accumulation.
    h = jnp.dot(x, w1_ref[...], preferred_element_type=jnp.float32)
    # bias + ReLU in f32 on the VPU (v5e has no bf16 VPU).
    h = jnp.maximum(h + b1_ref[...], 0.0)
    # fc2: bf16 operands, f32 accumulation; write narrow output in final dtype.
    y = jnp.dot(h.astype(jnp.bfloat16), w2_ref[...],
                preferred_element_type=jnp.float32)
    out_ref[...] = (y + b2_ref[...]).astype(out_ref.dtype)


# --------------------------------------------------------------------------
# Wrappers
# --------------------------------------------------------------------------
def _choose_batch_tiling(B: int, tile_b: int):
    """Pick (tb, B_pad) so tb is a multiple of 8, tb <= ~tile_b, and
    B_pad/B stays ~1 (avoid near-full-tile padding waste)."""
    B8 = _round_up(B, 8)
    tb_target = max(8, _round_up(min(tile_b, B8), 8))
    n_tiles = pl.cdiv(B8, tb_target)
    tb = _round_up(pl.cdiv(B8, n_tiles), 8)
    return tb, n_tiles * tb


def _forward_xla(x, params):
    """Plain fused XLA path for tiny batches (a single grid step can't win)."""
    w1p, b1p, w2p, b2p = params
    h = jnp.maximum(
        jnp.dot(x.astype(jnp.bfloat16), w1p, preferred_element_type=jnp.float32)
        + b1p, 0.0)
    y = jnp.dot(h.astype(jnp.bfloat16), w2p,
                preferred_element_type=jnp.float32) + b2p
    return y.astype(x.dtype)


def _forward_pallas(x, params, *, tile_b: int = 1024,
                    single_buffer_residents=None):
    w1p, b1p, w2p, b2p = params
    B, D_in = x.shape
    assert w1p.shape[0] == D_in, "w1 must be pre-transposed to (D_in, H)"
    H_p = w1p.shape[1]
    D_out = w2p.shape[1]

    tb, B_p = _choose_batch_tiling(B, tile_b)
    # Only the batch dim is ever padded (rows-only pad, usually a no-op).
    xp = x if B_p == B else jnp.pad(x, ((0, B_p - B), (0, 0)))

    x_sz = xp.dtype.itemsize
    out_sz = jnp.dtype(x.dtype).itemsize
    resident_bytes = sum(int(a.size) * a.dtype.itemsize
                         for a in (w1p, b1p, w2p, b2p))

    if single_buffer_residents is None:
        # Only worth bothering (v7x VMEM budget) once the weights are sizeable.
        single_buffer_residents = resident_bytes > _RESIDENT_SINGLE_BUF_BYTES

    def _resident_spec(shape):
        idx = lambda i: (0,) * len(shape)
        if single_buffer_residents and hasattr(pl, "Buffered"):
            try:
                # Constant index_map -> no double buffer needed (halves resident
                # weight VMEM per TC; matters on v7x's 64 MiB).
                return pl.BlockSpec(shape, idx, pipeline_mode=pl.Buffered(1))
            except TypeError:
                pass
        return pl.BlockSpec(shape, idx)

    # VMEM budget: x/out tiles double-buffered, residents (1x or 2x), plus the
    # in-kernel f32/bf16 temporaries; 2x safety margin, clamped to [32, 64] MiB.
    weight_buf = 1 if single_buffer_residents else 2
    need = (2 * tb * D_in * x_sz
            + 2 * tb * D_out * out_sz
            + weight_buf * resident_bytes
            + tb * D_in * 2              # bf16 cast of x tile
            + tb * H_p * (4 + 2)         # fc1 f32 acc + bf16 recast
            + tb * D_out * 4)            # fc2 f32 acc
    vmem_limit = int(min(max(2 * need, 32 << 20), 64 << 20))

    flops = 2 * B_p * (D_in * H_p + H_p * D_out)
    bytes_accessed = (B_p * D_in * x_sz + B_p * D_out * out_sz + resident_bytes)

    out_p = pl.pallas_call(
        _mlp_kernel,
        out_shape=jax.ShapeDtypeStruct((B_p, D_out), x.dtype),
        grid=(B_p // tb,),
        in_specs=[
            pl.BlockSpec((tb, D_in), lambda i: (i, 0)),   # x tile: pipelined
            _resident_spec(w1p.shape),                    # W1: VMEM-resident
            _resident_spec(b1p.shape),                    # b1: VMEM-resident
            _resident_spec(w2p.shape),                    # W2: VMEM-resident
            _resident_spec(b2p.shape),                    # b2: VMEM-resident
        ],
        out_specs=pl.BlockSpec((tb, D_out), lambda i: (i, 0)),
        compiler_params=pltpu.CompilerParams(
            dimension_semantics=("parallel",),            # megacore batch shard
            vmem_limit_bytes=vmem_limit),
        cost_estimate=pl.CostEstimate(
            flops=flops, transcendentals=0, bytes_accessed=bytes_accessed),
    )(xp, w1p, b1p, w2p, b2p)

    return out_p if B_p == B else out_p[:B]


def title_classifier_forward(x, params, *, tile_b: int = 1024,
                             use_pallas=None, single_buffer_residents=None):
    """x: (B, D_in); params: output of prepare_params(). Returns (B, D_out)."""
    if use_pallas is None:
        use_pallas = x.shape[0] >= _MIN_PALLAS_ROWS
    if not use_pallas:
        return _forward_xla(x, params)
    return _forward_pallas(x, params, tile_b=tile_b,
                           single_buffer_residents=single_buffer_residents)


# --------------------------------------------------------------------------
# Demo / self-test
# --------------------------------------------------------------------------
if __name__ == "__main__":
    # Shapes implied by TitleClassifier(input_dim, hidden_dim, output_dim).
    batch, input_dim, hidden_dim, output_dim = 8, 32, 64, 8

    key = jax.random.PRNGKey(0)
    kx, k1, k2, k3, k4 = jax.random.split(key, 5)

    x = jax.random.normal(kx, (batch, input_dim), dtype=jnp.float32)

    # Deterministic synthetic parameters (PyTorch-like uniform fan-in init),
    # already in the (in_features, out_features) layout the wrapper expects.
    bound1 = 1.0 / (input_dim ** 0.5)
    bound2 = 1.0 / (hidden_dim ** 0.5)
    w1 = jax.random.uniform(k1, (input_dim, hidden_dim), jnp.float32, -bound1, bound1)
    b1 = jax.random.uniform(k2, (hidden_dim,), jnp.float32, -bound1, bound1)
    w2 = jax.random.uniform(k3, (hidden_dim, output_dim), jnp.float32, -bound2, bound2)
    b2 = jax.random.uniform(k4, (output_dim,), jnp.float32, -bound2, bound2)

    # One-time padded/bf16 parameter cache (hoisted out of the per-call path).
    params = prepare_params(w1, b1, w2, b2)

    # Force the Pallas path even at this tiny demo batch so the kernel itself is
    # exercised; production dispatch would route B=8 to the XLA fallback.
    out = title_classifier_forward(x, params, use_pallas=True)
    out = jax.block_until_ready(out)

    # Reference in plain f32 JAX (same math as the PyTorch forward). The kernel
    # uses bf16 matmul operands, hence the loosened tolerance.
    ref = jnp.maximum(x @ w1 + b1, 0.0) @ w2 + b2
    assert out.shape == (batch, output_dim)
    assert out.dtype == x.dtype
    assert jnp.allclose(out, ref, atol=2e-2, rtol=2e-2), (
        f"max abs err {jnp.max(jnp.abs(out - ref))}")

    # Also sanity-check the tiny-batch XLA fallback path.
    out_small = jax.block_until_ready(title_classifier_forward(x, params))
    assert jnp.allclose(out_small, ref, atol=2e-2, rtol=2e-2)

    print("KERNEL_OK")
</pallas_src>

<mosaic_0001>
module attributes {stable_mosaic.version = 11 : i64} {
  func.func @_mlp_kernel(%arg0: i32, %arg1: memref<8x32xf32, #tpu.memory_space<vmem>>, %arg2: memref<32x128xbf16, #tpu.memory_space<vmem>>, %arg3: memref<1x128xf32, #tpu.memory_space<vmem>>, %arg4: memref<128x8xbf16, #tpu.memory_space<vmem>>, %arg5: memref<1x8xf32, #tpu.memory_space<vmem>>, %arg6: memref<8x8xf32, #tpu.memory_space<vmem>>) attributes {dimension_semantics = [#tpu.dimension_semantics<parallel>], iteration_bounds = array<i64: 1>, scalar_prefetch = 0 : i64, scratch_operands = 0 : i64, tpu.core_type = #tpu.core_type<tc>, window_params = [{transform_indices = @transform_0, window_bounds = array<i64: 8, 32>}, {pipeline_mode = #tpu.pipeline_mode<synchronous>, transform_indices = @transform_1, window_bounds = array<i64: 32, 128>}, {pipeline_mode = #tpu.pipeline_mode<synchronous>, transform_indices = @transform_2, window_bounds = array<i64: 1, 128>}, {pipeline_mode = #tpu.pipeline_mode<synchronous>, transform_indices = @transform_3, window_bounds = array<i64: 128, 8>}, {pipeline_mode = #tpu.pipeline_mode<synchronous>, transform_indices = @transform_4, window_bounds = array<i64: 1, 8>}, {transform_indices = @transform_5, window_bounds = array<i64: 8, 8>}]} {
    %c0 = arith.constant 0 : index
    %c0_0 = arith.constant 0 : index
    %0 = vector.load %arg1[%c0, %c0_0] : memref<8x32xf32, #tpu.memory_space<vmem>>, vector<8x32xf32>
    %1 = arith.truncf %0 : vector<8x32xf32> to vector<8x32xbf16>
    %c0_1 = arith.constant 0 : index
    %c0_2 = arith.constant 0 : index
    %2 = vector.load %arg2[%c0_1, %c0_2] : memref<32x128xbf16, #tpu.memory_space<vmem>>, vector<32x128xbf16>
    %cst = arith.constant dense<0.000000e+00> : vector<8x128xf32>
    %3 = tpu.matmul %1, %2, %cst {dimension_numbers = #tpu.dot_dimension_numbers<[1], [0], [0], [1], [0, 0, 1, 1], [], []>} : vector<8x32xbf16>, vector<32x128xbf16>, vector<8x128xf32> -> vector<8x128xf32>
    %c0_3 = arith.constant 0 : index
    %c0_4 = arith.constant 0 : index
    %4 = vector.load %arg3[%c0_3, %c0_4] : memref<1x128xf32, #tpu.memory_space<vmem>>, vector<1x128xf32>
    %5 = vector.broadcast %4 : vector<1x128xf32> to vector<8x128xf32>
    %6 = arith.addf %3, %5 : vector<8x128xf32>
    %cst_5 = arith.constant 0.000000e+00 : f32
    %7 = vector.broadcast %cst_5 : f32 to vector<8x128xf32>
    %8 = arith.maximumf %6, %7 : vector<8x128xf32>
    %9 = arith.truncf %8 : vector<8x128xf32> to vector<8x128xbf16>
    %c0_6 = arith.constant 0 : index
    %c0_7 = arith.constant 0 : index
    %10 = vector.load %arg4[%c0_6, %c0_7] : memref<128x8xbf16, #tpu.memory_space<vmem>>, vector<128x8xbf16>
    %cst_8 = arith.constant dense<0.000000e+00> : vector<8x8xf32>
    %11 = tpu.matmul %9, %10, %cst_8 {dimension_numbers = #tpu.dot_dimension_numbers<[1], [0], [0], [1], [0, 0, 1, 1], [], []>} : vector<8x128xbf16>, vector<128x8xbf16>, vector<8x8xf32> -> vector<8x8xf32>
    %c0_9 = arith.constant 0 : index
    %c0_10 = arith.constant 0 : index
    %12 = vector.load %arg5[%c0_9, %c0_10] : memref<1x8xf32, #tpu.memory_space<vmem>>, vector<1x8xf32>
    %13 = vector.broadcast %12 : vector<1x8xf32> to vector<8x8xf32>
    %14 = arith.addf %11, %13 : vector<8x8xf32>
    %c0_11 = arith.constant 0 : index
    %c0_12 = arith.constant 0 : index
    %15 = vector.load %arg6[%c0_11, %c0_12] : memref<8x8xf32, #tpu.memory_space<vmem>>, vector<8x8xf32>
    tpu.vector_store %arg6[%c0_11, %c0_12], %14 {strides = array<i32>} : memref<8x8xf32, #tpu.memory_space<vmem>>, vector<8x8xf32>,
    return
  }
  func.func @transform_0(%arg0: i32) -> (i32, i32) {
    %c0_i32 = arith.constant 0 : i32
    %c0_i32_0 = arith.constant 0 : i32
    return %arg0, %c0_i32 : i32, i32
  }
  func.func @transform_1(%arg0: i32) -> (i32, i32) {
    %c0_i32 = arith.constant 0 : i32
    %c0_i32_0 = arith.constant 0 : i32
    %c0_i32_1 = arith.constant 0 : i32
    return %c0_i32, %c0_i32_0 : i32, i32
  }
  func.func @transform_2(%arg0: i32) -> (i32, i32) {
    %c0_i32 = arith.constant 0 : i32
    %c0_i32_0 = arith.constant 0 : i32
    %c0_i32_1 = arith.constant 0 : i32
    return %c0_i32, %c0_i32_0 : i32, i32
  }
  func.func @transform_3(%arg0: i32) -> (i32, i32) {
    %c0_i32 = arith.constant 0 : i32
    %c0_i32_0 = arith.constant 0 : i32
    %c0_i32_1 = arith.constant 0 : i32
    return %c0_i32, %c0_i32_0 : i32, i32
  }
  func.func @transform_4(%arg0: i32) -> (i32, i32) {
    %c0_i32 = arith.constant 0 : i32
    %c0_i32_0 = arith.constant 0 : i32
    %c0_i32_1 = arith.constant 0 : i32
    return %c0_i32, %c0_i32_0 : i32, i32
  }
  func.func @transform_5(%arg0: i32) -> (i32, i32) {
    %c0_i32 = arith.constant 0 : i32
    %c0_i32_0 = arith.constant 0 : i32
    return %arg0, %c0_i32 : i32, i32
  }
}

</mosaic_0001>

<bundles_post_ra>
// kernel: tpu_custom_call.1
= control target key start
LH: loop header
LB: loop body
LE: loop exit
PB: predicated region body
PF: predicated region fallthrough
CT: control target
= control target key end

     0   :  { %v310_v1 = vmov 0.0   ;;  %vm311_vm0 = vmmov 0   ;;  %vm47_vm1 = vcmask 261120   ;;  %s394_s0 = inlined_call_operand.vmem [shape: f32[8,32], index: 0, kind: input, shape index: {}]   ;;  %s395_s1 = inlined_call_operand.vmem [shape: bf16[32,128], index: 1, kind: input, shape index: {}]   ;;  %s396_s2 = inlined_call_operand.vmem [shape: f32[1,128], index: 2, kind: input, shape index: {}]   ;;  %s397_s3 = inlined_call_operand.vmem [shape: bf16[128,8], index: 3, kind: input, shape index: {}]   ;;  %s398_s4 = inlined_call_operand.vmem [shape: f32[1,8], index: 4, kind: input, shape index: {}]   ;;  %s399_s5 = inlined_call_operand.hbm [shape: f32[8,8], index: 5, kind: output, shape index: {}]  }
   0x1   :  { %v276_v0 = vld [vmem:[%s395_s1] sm:$0xff]   ;;  %245 = vmatprep.subr.bf16.mxu0 %v310_v1  ;;  %v277_v2 = vld [vmem:[%s395_s1 + $0x8] sm:$0xff]   ;;  %253 = vmatprep.subr.bf16.mxu1 %v310_v1  ;;  %v280_v7 = vld [vmem:[%s397_s3 + $0x10] sm:$0xff]  }
   0x2   :  { %246 = vmatpush3.bf16.msra.mxu0 %v276_v0  ;;  %249 = vmatprep.mubr.msk.bf16.mxu0 %vm311_vm0, %v310_v1  ;;  %v22_v3 = vld [vmem:[%s394_s0] sm:$0xff]  ;;  %v279_v6 = vld [vmem:[%s397_s3 + $0x8] sm:$0xff]  }
   0x3   :  { %247 = vmatprep.subr.bf16.mxu0 %v310_v1  ;;  %v278_v4 = vld [vmem:[%s397_s3] sm:$0xff]   ;;  %269 = vmatprep.mubr.msk.bf16.mxu1 %vm311_vm0, %v310_v1  ;;  %v23_v5 = vpack.c.bf16 %v22_v3, %v22_v3 }
   0x4   :  { %254 = vmatpush3.bf16.msra.mxu1 %v278_v4 }
   0x5   :  { %255 = vmatprep.subr.bf16.mxu1 %v310_v1 }
   0x6   :  { %248 = vmatpush3.bf16.msra.mxu0 %v277_v2 }
   0x8   :  { %256 = vmatpush3.bf16.msra.mxu1 %v279_v6 }
   0x9   :  { %250 = vmatmul.mubr.msk.bf16.vlgmr.msra.gmra.mrb[0].mxu0 %vm47_vm1, %v23_v5  ;;  %257 = vmatprep.subr.bf16.mxu1 %v310_v1 }
   0xa   :  { %10 = vsyncpa [#allocation3], 0  ;;  %v281_v8 = vld [vmem:[%s397_s3 + $0x18] sm:$0xff]   ;;  %v282_v9 = vld [vmem:[%s397_s3 + $0x20] sm:$0xff]   ;;  %s312_s17 = smov [#allocation2]   ;;  %vm204_vm2 = vcmask 64512  }
   0xb   :  { %v283_v10 = vld [vmem:[%s397_s3 + $0x28] sm:$0xff]   ;;  %v284_v11 = vld [vmem:[%s397_s3 + $0x30] sm:$0xff]   ;;  %v285_v12 = vld [vmem:[%s397_s3 + $0x38] sm:$0xff]   ;;  %s212_s18 = sshll.u32 %s312_s17, 4  ;;  %s213_s18 = int_to_ptr.vmem [resolvable:$true] %s212_s18 }
   0xc   :  { %258 = vmatpush3.bf16.msra.mxu1 %v280_v7  ;;  %v220_v13 = vld [vmem:[%s396_s2] ss:$0 sm:$0xff]  ;;  %s286_s2 = scalar_lea.vmem %s213_s18, 128  ;;  %p291_p1 = scmp.lt.s32.totalorder %s213_s18, %s213_s18 }
   0xd   :  { %259 = vmatprep.subr.bf16.mxu1 %v310_v1  ;;  %v224_v21 = vld [vmem:[%s398_s4] ss:$0 sm:$0xff]  ;;  %p287_p0 = scmp.ne.s32.totalorder %s213_s18, %s286_s2  ;;  %p292_p2 = scmp.lt.s32.totalorder %s286_s2, %s286_s2 }
   0xf   :  { %p293_p3 = por %p292_p2, %p291_p1 }
  0x10   :  { %260 = vmatpush3.bf16.msra.mxu1 %v281_v8 }
  0x11   :  { %261 = vmatprep.subr.bf16.mxu1 %v310_v1  ;;  %p294_p4 = pnand %p293_p3, %p287_p0 }
  0x14   :  { %262 = vmatpush3.bf16.msra.mxu1 %v282_v9 }
  0x15   :  { %263 = vmatprep.subr.bf16.mxu1 %v310_v1 }
  0x18   :  { %264 = vmatpush3.bf16.msra.mxu1 %v283_v10 }
  0x19   :  { %265 = vmatprep.subr.bf16.mxu1 %v310_v1 }
  0x1c   :  { %266 = vmatpush3.bf16.msra.mxu1 %v284_v11 }
  0x1d   :  { %267 = vmatprep.subr.bf16.mxu1 %v310_v1 }
  0x20   :  { %268 = vmatpush3.bf16.msra.mxu1 %v285_v12 }
  0xdc   :  { %v85_v14 = vpop.f32.mrb[0].mxu0 }
  0xdd   :  { %v86_v15 = vadd.f32 %v220_v13, %v85_v14  ;;  %v251_v16 = vpop.f32.mrb[1].mxu0 }
  0xde   :  { %v88_v17 = vpop.f32.mrb[2].mxu0 }
  0xdf   :  { %v91_v18 = vmax.f32 %v86_v15, 0.0  ;;  %v252_v19 = vpop.f32.mrb[3].mxu0 }
  0xe1   :  { %v92_v20 = vpack.c.bf16 %v91_v18, %v91_v18 }
  0xe3   :  { %270 = vmatmul.mubr.bf16.vlgmr.msra.gmra.mrb[0].mxu1 %v92_v20 }
 0x1b6   :  { %v198_v22 = vpop.f32.mrb[0].mxu1 }
 0x1b7   :  { %v199_v23 = vadd.f32 %v224_v21, %v198_v22  ;;  %v271_v24 = vpop.f32.mrb[1].mxu1 }
 0x1b8   :  { %v201_v25 = vpop.f32.mrb[2].mxu1 }
 0x1b9   :  { %v272_v26 = vpop.f32.mrb[3].mxu1  ;;  %205 = vst.msk [vmem:[#allocation2] sm:$0xff] %vm204_vm2, %v199_v23 }
 0x1ba   :  { %297 = shalt.err (!%p294_p4)
}
 0x1bb   :  { %s298_s4 = scalar_lea.hbm %s399_s5, 128 }
 0x1bc   :  { %p299_p5 = scmp.ne.s32.totalorder %s399_s5, %s298_s4  ;;  %p302_p6 = scmp.lt.u32.totalorder %s298_s4, %s399_s5 }
 0x1be   :  { %p304_p7 = pnand %p302_p6, %p299_p5 }
 0x1c0   :  { %307 = shalt.err (!%p304_p7)
}
 0x1c1   :  { %215 = dma.vmem_to_hbm [thread:$0]  %s213_s18, 128, %s399_s5, [#allocation3]  }
 0x1c2   :  { %308 = dma.done.wait [#allocation3], 128  }
 0x1c3   :  { %309 = vsyncadd [#allocation3], 4294967168 }
 0x1c4   :  { %219 = vsyncpa [#allocation3], 1 }

</bundles_post_ra>
